<compile_context>
chip_gen: v7x
topology: tpu7x:2x2x1
jax: 0.10.0
libtpu: 0.0.40
codegen_flags: <defaults>
</compile_context>

<pallas_src>
import functools
import math

import numpy as np
import jax
import jax.numpy as jnp
from jax.experimental import pallas as pl
from jax.experimental.pallas import tpu as pltpu

_LANE_COLS = 512          # lane-dense width (multiple of 128 -> unmasked vst)
_TARGET_BLOCK_BYTES = 2 * 1024 * 1024   # ~2 MiB per block (sweet spot for mem-bound elementwise)


def _dropout_kernel(seed_ref, x_ref, o_ref, *, rate, tile_rows, cols):
    """One (tile_rows, cols) tile: counter-based PRNG mask + scaled keep."""
    shape = x_ref.shape  # static (tile_rows, cols)

    # Global element index of every element in this tile (uint32, wraps for huge tensors).
    row0 = (pl.program_id(0) * tile_rows).astype(jnp.uint32)
    row_ids = jax.lax.broadcasted_iota(jnp.int32, shape, 0).astype(jnp.uint32) + row0
    col_ids = jax.lax.broadcasted_iota(jnp.int32, shape, 1).astype(jnp.uint32)
    idx = row_ids * jnp.uint32(cols) + col_ids

    # Mix with the (runtime) seed, then murmur3 fmix32 finalizer -> well-scrambled uint32.
    seed = seed_ref[0].astype(jnp.uint32)
    h = idx * jnp.uint32(0x9E3779B1) + seed * jnp.uint32(0x85EBCA6B) + jnp.uint32(0x6C078965)
    h = h ^ (h >> jnp.uint32(16))
    h = h * jnp.uint32(0x85EBCA6B)
    h = h ^ (h >> jnp.uint32(13))
    h = h * jnp.uint32(0xC2B2AE35)
    h = h ^ (h >> jnp.uint32(16))

    # Uniform [0,1) from the top 24 bits; keep with prob (1 - rate).
    u = (h >> jnp.uint32(8)).astype(jnp.int32).astype(jnp.float32) * jnp.float32(1.0 / (1 << 24))
    keep = u >= jnp.float32(rate)

    # Compute mask/rescale in f32, cast back to output dtype (avoids bf16 rescale rounding).
    x = x_ref[...].astype(jnp.float32)
    scale = jnp.float32(1.0 / (1.0 - rate))
    o_ref[...] = jnp.where(keep, x * scale, jnp.float32(0.0)).astype(o_ref.dtype)


def _dropout_pallas(x2d, rate, seed, tile_rows):
    rows, cols = x2d.shape
    kernel = functools.partial(_dropout_kernel, rate=rate, tile_rows=tile_rows, cols=cols)
    grid_spec = pltpu.PrefetchScalarGridSpec(
        num_scalar_prefetch=1,
        grid=(pl.cdiv(rows, tile_rows),),
        in_specs=[pl.BlockSpec((tile_rows, cols), lambda i, seed_ref: (i, 0))],
        out_specs=pl.BlockSpec((tile_rows, cols), lambda i, seed_ref: (i, 0)),
    )
    return pl.pallas_call(
        kernel,
        out_shape=jax.ShapeDtypeStruct(x2d.shape, x2d.dtype),
        grid_spec=grid_spec,
        compiler_params=pltpu.CompilerParams(
            dimension_semantics=("parallel",),  # lets v7x shard the row grid across both TCs
        ),
    )(jnp.asarray([seed], dtype=jnp.int32), x2d)


def mc_dropout(x, *, rate, dropout_on_infer, training=False, seed=0):
    """Forward pass of MCDropout.

    dropout_on_infer=True  -> dropout always applied (Monte-Carlo dropout at inference).
    dropout_on_infer=False -> dropout applied only when `training` is True.
    """
    apply_dropout = dropout_on_infer or training
    if (not apply_dropout) or rate == 0.0:
        return x  # identity path; no compute needed
    if rate >= 1.0:
        return jnp.zeros_like(x)

    orig_shape = x.shape
    total = int(math.prod(orig_shape)) if orig_shape else 1

    # Lane-dense 2-D view: last dim a multiple of 128; pad the flattened tail if needed.
    cols = _LANE_COLS if total >= _LANE_COLS else 128
    rows = -(-total // cols)
    padded = rows * cols
    xf = x.reshape(-1)
    if padded != total:
        xf = jnp.pad(xf, (0, padded - total))
    x2d = xf.reshape(rows, cols)

    # ~2 MiB blocks, multiple of 8 rows (or the full row extent for small inputs).
    tile_rows = _TARGET_BLOCK_BYTES // (cols * x2d.dtype.itemsize)
    tile_rows = max(8, (tile_rows // 8) * 8)
    tile_rows = min(rows, tile_rows)

    out2d = _dropout_pallas(x2d, float(rate), int(seed), tile_rows)
    out = out2d.reshape(-1)
    if padded != total:
        out = out[:total]
    return out.reshape(orig_shape)


if __name__ == "__main__":
    key = jax.random.PRNGKey(0)
    # Small NCHW input consistent with an elementwise module.
    x = jax.random.normal(key, (2, 4, 16, 16), dtype=jnp.float32)
    x_np = np.asarray(x)

    rate = 0.5
    # dropout_on_infer=True branch: dropout applied regardless of training flag.
    y = mc_dropout(x, rate=rate, dropout_on_infer=True, training=False, seed=1234)
    y = jax.block_until_ready(y)
    y_np = np.asarray(y)

    # Sanity checks on dropout semantics (mask + 1/(1-p) rescale).
    keep_mask = y_np != 0.0
    keep_frac = keep_mask.mean()
    assert 0.35 < keep_frac < 0.65, f"unexpected keep fraction {keep_frac}"
    assert np.allclose(y_np[keep_mask], x_np[keep_mask] / (1.0 - rate), rtol=1e-5, atol=1e-6)

    # dropout_on_infer=False, eval mode -> identity.
    y_id = jax.block_until_ready(mc_dropout(x, rate=rate, dropout_on_infer=False, training=False))
    assert np.array_equal(np.asarray(y_id), x_np)

    # Non-lane-friendly shape exercises the padding path.
    x2 = jax.random.normal(jax.random.PRNGKey(1), (3, 5, 7), dtype=jnp.float32)
    y2 = jax.block_until_ready(mc_dropout(x2, rate=0.3, dropout_on_infer=True, seed=7))
    x2_np, y2_np = np.asarray(x2), np.asarray(y2)
    ok = np.isclose(y2_np, 0.0) | np.isclose(y2_np, x2_np / 0.7, rtol=1e-5, atol=1e-6)
    assert ok.all()

    print("KERNEL_OK")
</pallas_src>

<mosaic_0001>
module attributes {stable_mosaic.version = 11 : i64} {
  func.func @_dropout_kernel(%arg0: i32, %arg1: memref<1xi32, #tpu.memory_space<smem>>, %arg2: memref<4x512xf32, #tpu.memory_space<vmem>>, %arg3: memref<4x512xf32, #tpu.memory_space<vmem>>) attributes {dimension_semantics = [#tpu.dimension_semantics<parallel>], iteration_bounds = array<i64: 1>, scalar_prefetch = 1 : i64, scratch_operands = 0 : i64, tpu.core_type = #tpu.core_type<tc>, window_params = [{transform_indices = @transform_0, window_bounds = array<i64: 4, 512>}, {transform_indices = @transform_1, window_bounds = array<i64: 4, 512>}]} {
    %c4_i32 = arith.constant 4 : i32
    %0 = arith.muli %arg0, %c4_i32 : i32
    %1 = tpu.iota {dimensions = array<i32: 0>} : vector<4x512xi32>
    %2 = vector.broadcast %0 : i32 to vector<4x512xi32>
    %3 = arith.addi %1, %2 : vector<4x512xi32>
    %4 = tpu.iota {dimensions = array<i32: 1>} : vector<4x512xi32>
    %c512_i32 = arith.constant 512 : i32
    %5 = vector.broadcast %c512_i32 : i32 to vector<4x512xi32>
    %6 = arith.muli %3, %5 : vector<4x512xi32>
    %7 = arith.addi %6, %4 : vector<4x512xi32>
    %c0 = arith.constant 0 : index
    %8 = memref.load %arg1[%c0] : memref<1xi32, #tpu.memory_space<smem>>
    %c-1640531535_i32 = arith.constant -1640531535 : i32
    %9 = vector.broadcast %c-1640531535_i32 : i32 to vector<4x512xi32>
    %10 = arith.muli %7, %9 : vector<4x512xi32>
    %c-2048144789_i32 = arith.constant -2048144789 : i32
    %11 = arith.muli %8, %c-2048144789_i32 : i32
    %12 = vector.broadcast %11 : i32 to vector<4x512xi32>
    %13 = arith.addi %10, %12 : vector<4x512xi32>
    %c1812433253_i32 = arith.constant 1812433253 : i32
    %14 = vector.broadcast %c1812433253_i32 : i32 to vector<4x512xi32>
    %15 = arith.addi %13, %14 : vector<4x512xi32>
    %c16_i32 = arith.constant 16 : i32
    %16 = vector.broadcast %c16_i32 : i32 to vector<4x512xi32>
    %17 = arith.shrui %15, %16 : vector<4x512xi32>
    %18 = arith.xori %15, %17 : vector<4x512xi32>
    %c-2048144789_i32_0 = arith.constant -2048144789 : i32
    %19 = vector.broadcast %c-2048144789_i32_0 : i32 to vector<4x512xi32>
    %20 = arith.muli %18, %19 : vector<4x512xi32>
    %c13_i32 = arith.constant 13 : i32
    %21 = vector.broadcast %c13_i32 : i32 to vector<4x512xi32>
    %22 = arith.shrui %20, %21 : vector<4x512xi32>
    %23 = arith.xori %20, %22 : vector<4x512xi32>
    %c-1028477387_i32 = arith.constant -1028477387 : i32
    %24 = vector.broadcast %c-1028477387_i32 : i32 to vector<4x512xi32>
    %25 = arith.muli %23, %24 : vector<4x512xi32>
    %c16_i32_1 = arith.constant 16 : i32
    %26 = vector.broadcast %c16_i32_1 : i32 to vector<4x512xi32>
    %27 = arith.shrui %25, %26 : vector<4x512xi32>
    %28 = arith.xori %25, %27 : vector<4x512xi32>
    %c8_i32 = arith.constant 8 : i32
    %29 = vector.broadcast %c8_i32 : i32 to vector<4x512xi32>
    %30 = arith.shrui %28, %29 : vector<4x512xi32>
    %31 = arith.sitofp %30 : vector<4x512xi32> to vector<4x512xf32>
    %cst = arith.constant 5.96046448E-8 : f32
    %32 = vector.broadcast %cst : f32 to vector<4x512xf32>
    %33 = arith.mulf %31, %32 : vector<4x512xf32>
    %cst_2 = arith.constant 5.000000e-01 : f32
    %34 = vector.broadcast %cst_2 : f32 to vector<4x512xf32>
    %35 = arith.cmpf oge, %33, %34 : vector<4x512xf32>
    %c0_3 = arith.constant 0 : index
    %c0_4 = arith.constant 0 : index
    %36 = vector.load %arg2[%c0_3, %c0_4] : memref<4x512xf32, #tpu.memory_space<vmem>>, vector<4x512xf32>
    %cst_5 = arith.constant 2.000000e+00 : f32
    %37 = vector.broadcast %cst_5 : f32 to vector<4x512xf32>
    %38 = arith.mulf %36, %37 : vector<4x512xf32>
    %cst_6 = arith.constant 0.000000e+00 : f32
    %39 = vector.broadcast %cst_6 : f32 to vector<4x512xf32>
    %40 = arith.select %35, %38, %39 : vector<4x512xi1>, vector<4x512xf32>
    %c0_7 = arith.constant 0 : index
    %c0_8 = arith.constant 0 : index
    %41 = vector.load %arg3[%c0_7, %c0_8] : memref<4x512xf32, #tpu.memory_space<vmem>>, vector<4x512xf32>
    tpu.vector_store %arg3[%c0_7, %c0_8], %40 {strides = array<i32>} : memref<4x512xf32, #tpu.memory_space<vmem>>, vector<4x512xf32>,
    return
  }
  func.func @transform_0(%arg0: i32, %arg1: memref<1xi32, #tpu.memory_space<smem>>) -> (i32, i32) {
    %c0_i32 = arith.constant 0 : i32
    %c0_i32_0 = arith.constant 0 : i32
    return %arg0, %c0_i32 : i32, i32
  }
  func.func @transform_1(%arg0: i32, %arg1: memref<1xi32, #tpu.memory_space<smem>>) -> (i32, i32) {
    %c0_i32 = arith.constant 0 : i32
    %c0_i32_0 = arith.constant 0 : i32
    return %arg0, %c0_i32 : i32, i32
  }
}

</mosaic_0001>

<bundles_post_ra>
// kernel: tpu_custom_call.1
= control target key start
LH: loop header
LB: loop body
LE: loop exit
PB: predicated region body
PF: predicated region fallthrough
CT: control target
= control target key end

     0   :  { %8 = vsyncpa [#allocation5], 0  ;;  %s234_s0 = inlined_call_operand.<no memory space> [shape: s32[1], index: 0, kind: input, shape index: {}]   ;;  %s235_s1 = inlined_call_operand.hbm [shape: f32[4,512], index: 1, kind: input, shape index: {}]   ;;  %s236_s2 = inlined_call_operand.hbm [shape: f32[4,512], index: 2, kind: output, shape index: {}]  }
   0x1   :  { %9 = vsyncpa [#allocation6], 0  ;;  %s190_s9 = smov [#allocation4]   ;;  %s142_s13 = scalar_lea.hbm %s235_s1, 256 }
   0x2   :  { %s16_s10 = sshll.u32 %s190_s9, 4  ;;  %p143_p0 = scmp.ne.s32.totalorder %s235_s1, %s142_s13  ;;  %s17_s10 = int_to_ptr.vmem [resolvable:$true] %s16_s10 }
   0x3   :  { %p146_p1 = scmp.lt.u32.totalorder %s142_s13, %s235_s1 }
   0x5   :  { %p148_p2 = pnand %p146_p1, %p143_p0 }
   0x7   :  { %151 = shalt.err (!%p148_p2)
}
   0x8   :  { %s152_s18 = scalar_lea.vmem %s17_s10, 256  ;;  %p157_p4 = scmp.lt.s32.totalorder %s17_s10, %s17_s10 }
   0x9   :  { %p153_p3 = scmp.ne.s32.totalorder %s17_s10, %s152_s18  ;;  %p158_p5 = scmp.lt.s32.totalorder %s152_s18, %s152_s18 }
   0xb   :  { %p159_p6 = por %p158_p5, %p157_p4 }
   0xd   :  { %p160_p7 = pnand %p159_p6, %p153_p3 }
   0xf   :  { %163 = shalt.err (!%p160_p7)
}
  0x10   :  { %19 = dma.hbm_to_vmem [thread:$0]  %s235_s1, 256, %s17_s10, [#allocation5]  }
  0x11   :  { %186 = dma.done.wait [#allocation5], 256  }
  0x12   :  { %187 = vsyncadd [#allocation5], 4294967040  ;;  %v24_v0 = vlaneseq  ;;  %s43_s23 = smul.u32 2246822507, %s234_s0  ;;  %v101_v50 = vld [vmem:[#allocation4] sm:$0xff]  ;;  %v102_v53 = vld [vmem:[#allocation4 + $0x8] sm:$0xff] }
  0x13   :  { %v103_v56 = vmul.f32 2.0, %v101_v50  ;;  %v104_v61 = vmul.f32 2.0, %v102_v53  ;;  %s191_s0 = smov [#allocation7]  }
  0x14   :  { %v25_v1 = vshrl.u32 %v24_v0, 7  ;;  %v29_v2 = vand.u32 127, %v24_v0  ;;  %v44_v11 = vstv %s43_s23  ;;  %s131_s1 = sshll.u32 %s191_s0, 4  ;;  %s132_s1 = int_to_ptr.vmem [resolvable:$true] %s131_s1 }
  0x15   :  { %s164_s24 = scalar_lea.vmem %s132_s1, 256  ;;  %p169_p9 = scmp.lt.s32.totalorder %s132_s1, %s132_s1 }
  0x16   :  { %v30_v3 = vadd.s32 128, %v29_v2  ;;  %v33_v4 = vmul.u32 512, %v25_v1  ;;  %v31_v5 = vadd.s32 256, %v29_v2  ;;  %v32_v6 = vadd.s32 384, %v29_v2  ;;  %p165_p8 = scmp.ne.s32.totalorder %s132_s1, %s164_s24  ;;  %p170_p10 = scmp.lt.s32.totalorder %s164_s24, %s164_s24 }
  0x18   :  { %v34_v7 = vadd.s32 %v33_v4, %v29_v2  ;;  %v35_v8 = vadd.s32 %v33_v4, %v30_v3  ;;  %v36_v9 = vadd.s32 %v33_v4, %v31_v5  ;;  %v37_v10 = vadd.s32 %v33_v4, %v32_v6  ;;  %p171_p11 = por %p170_p10, %p169_p9 }
  0x19   :  { %v107_v2 = vcombine.high %v103_v56, %v103_v56 }
  0x1a   :  { %v39_v12 = vmul.u32 2654435761, %v34_v7  ;;  %v40_v13 = vmul.u32 2654435761, %v35_v8  ;;  %v108_v7 = vcombine.high %v104_v61, %v104_v61  ;;  %p172_p12 = pnand %p171_p11, %p165_p8 }
  0x1b   :  { %v41_v14 = vmul.u32 2654435761, %v36_v9  ;;  %v42_v15 = vmul.u32 2654435761, %v37_v10 }
  0x1c   :  { %v45_v16 = vadd.s32 %v44_v11, %v39_v12  ;;  %v46_v17 = vadd.s32 %v44_v11, %v40_v13 }
  0x1d   :  { %v47_v18 = vadd.s32 %v44_v11, %v41_v14  ;;  %v48_v19 = vadd.s32 %v44_v11, %v42_v15 }
  0x1e   :  { %v49_v20 = vadd.s32 1812433253, %v45_v16  ;;  %v50_v21 = vadd.s32 1812433253, %v46_v17 }
  0x1f   :  { %v51_v22 = vadd.s32 1812433253, %v47_v18  ;;  %v52_v23 = vadd.s32 1812433253, %v48_v19 }
  0x20   :  { %v53_v24 = vshrl.u32 %v49_v20, 16  ;;  %v54_v25 = vshrl.u32 %v50_v21, 16 }
  0x21   :  { %v55_v26 = vshrl.u32 %v51_v22, 16  ;;  %v56_v27 = vshrl.u32 %v52_v23, 16 }
  0x22   :  { %v57_v28 = vxor.u32 %v53_v24, %v49_v20  ;;  %v58_v29 = vxor.u32 %v54_v25, %v50_v21 }
  0x23   :  { %v59_v30 = vxor.u32 %v55_v26, %v51_v22  ;;  %v60_v31 = vxor.u32 %v56_v27, %v52_v23 }
  0x24   :  { %v61_v32 = vmul.u32 2246822507, %v57_v28  ;;  %v62_v33 = vmul.u32 2246822507, %v58_v29 }
  0x25   :  { %v63_v34 = vmul.u32 2246822507, %v59_v30  ;;  %v64_v35 = vmul.u32 2246822507, %v60_v31 }
  0x26   :  { %v65_v36 = vshrl.u32 %v61_v32, 13  ;;  %v66_v37 = vshrl.u32 %v62_v33, 13 }
  0x27   :  { %v67_v38 = vshrl.u32 %v63_v34, 13  ;;  %v68_v39 = vshrl.u32 %v64_v35, 13 }
  0x28   :  { %v69_v40 = vxor.u32 %v65_v36, %v61_v32  ;;  %v70_v41 = vxor.u32 %v66_v37, %v62_v33 }
  0x29   :  { %v71_v42 = vxor.u32 %v67_v38, %v63_v34  ;;  %v72_v43 = vxor.u32 %v68_v39, %v64_v35 }
  0x2a   :  { %v73_v44 = vmul.u32 3266489909, %v69_v40  ;;  %v74_v45 = vmul.u32 3266489909, %v70_v41 }
  0x2b   :  { %v75_v46 = vmul.u32 3266489909, %v71_v42  ;;  %v76_v47 = vmul.u32 3266489909, %v72_v43 }
  0x2c   :  { %v77_v48 = vshrl.u32 %v73_v44, 16  ;;  %v78_v49 = vshrl.u32 %v74_v45, 16 }
  0x2d   :  { %v79_v51 = vshrl.u32 %v75_v46, 16  ;;  %v80_v52 = vshrl.u32 %v76_v47, 16 }
  0x2e   :  { %v81_v54 = vxor.u32 %v77_v48, %v73_v44  ;;  %v82_v55 = vxor.u32 %v78_v49, %v74_v45 }
  0x2f   :  { %v83_v57 = vxor.u32 %v79_v51, %v75_v46  ;;  %v84_v58 = vxor.u32 %v80_v52, %v76_v47 }
  0x30   :  { %v85_v59 = vshrl.u32 %v81_v54, 8  ;;  %v86_v60 = vshrl.u32 %v82_v55, 8 }
  0x31   :  { %v87_v62 = vshrl.u32 %v83_v57, 8  ;;  %v88_v63 = vshrl.u32 %v84_v58, 8 }
  0x32   :  { %v89_v0 = vcvt.s32.f32 %v85_v59  ;;  %v90_v1 = vcvt.s32.f32 %v86_v60 }
  0x33   :  { %v91_v3 = vcvt.s32.f32 %v87_v62  ;;  %v92_v4 = vcvt.s32.f32 %v88_v63 }
  0x34   :  { %v93_v5 = vmul.f32 5.9604645e-08, %v89_v0  ;;  %v94_v6 = vmul.f32 5.9604645e-08, %v90_v1 }
  0x35   :  { %v95_v8 = vmul.f32 5.9604645e-08, %v91_v3  ;;  %v96_v9 = vmul.f32 5.9604645e-08, %v92_v4 }
  0x36   :  { %vm97_vm0 = vcmp.ge.f32.partialorder %v93_v5, 0.5  ;;  %vm98_vm1 = vcmp.ge.f32.partialorder %v94_v6, 0.5 }
  0x37   :  { %v111_v10 = vsel %vm97_vm0, %v103_v56, 0.0  ;;  %v112_v11 = vsel %vm98_vm1, %v107_v2, 0.0  ;;  %vm99_vm2 = vcmp.ge.f32.partialorder %v95_v8, 0.5  ;;  %vm100_vm3 = vcmp.ge.f32.partialorder %v96_v9, 0.5 }
  0x38   :  { %v119_v12 = vcombine.low %v111_v10, %v112_v11  ;;  %v113_v13 = vsel %vm99_vm2, %v104_v61, 0.0  ;;  %v114_v14 = vsel %vm100_vm3, %v108_v7, 0.0 }
  0x39   :  { %v120_v15 = vcombine.low %v113_v13, %v114_v14 }
  0x3a   :  { %123 = vst [vmem:[#allocation7] sm:$0xff] %v119_v12 }
  0x3b   :  { %124 = vst [vmem:[#allocation7 + $0x8] sm:$0xff] %v120_v15 }
  0x3c   :  { %175 = shalt.err (!%p172_p12)
}
  0x3d   :  { %s176_s27 = scalar_lea.hbm %s236_s2, 256 }
  0x3e   :  { %p177_p13 = scmp.ne.s32.totalorder %s236_s2, %s176_s27  ;;  %p180_p0 = scmp.lt.u32.totalorder %s176_s27, %s236_s2 }
  0x40   :  { %p182_p1 = pnand %p180_p0, %p177_p13 }
  0x42   :  { %185 = shalt.err (!%p182_p1)
}
  0x43   :  { %134 = dma.vmem_to_hbm [thread:$0]  %s132_s1, 256, %s236_s2, [#allocation6]  }
  0x44   :  { %188 = dma.done.wait [#allocation6], 256  }
  0x45   :  { %189 = vsyncadd [#allocation6], 4294967040 }
  0x46   :  { %138 = vsyncpa [#allocation5], 1 }
  0x47   :  { %139 = vsyncpa [#allocation6], 1 }

</bundles_post_ra>
